<compile_context>
chip_gen: v7x
topology: tpu7x:2x2x1
jax: 0.10.0
libtpu: 0.0.40
codegen_flags: <defaults>
</compile_context>

<pallas_src>
import jax
import jax.numpy as jnp
from jax.experimental import pallas as pl
from jax.experimental.pallas import tpu as pltpu


_LANE = 128
_SINGLE_BLOCK_BYTES = 8 * 1024 * 1024   # whole batch resident -> grid collapses
_STREAM_BLOCK_BYTES = 4 * 1024 * 1024   # per-step block target when streaming


def _round_up(n: int, m: int) -> int:
    return ((n + m - 1) // m) * m


# ---------------------------------------------------------------------------
# Pallas kernel: lane-dense streamed Gram matrix  gram = Z^T Z
# ---------------------------------------------------------------------------
_CONTRACT_LANES = (((1,), (1,)), ((), ()))   # contract the lane (batch) axis


def _gram_kernel(zt_ref, gram_ref):
    """Accumulate the (G, G) Gram matrix of the (G, TB) lane-dense block."""
    @pl.when(pl.program_id(1) == 0)
    def _init():
        gram_ref[...] = jnp.zeros_like(gram_ref)

    zb = zt_ref[...]                                      # (G, TB), f32
    gram_ref[...] += jax.lax.dot_general(                 # Z_blk @ Z_blk^T
        zb, zb, _CONTRACT_LANES, preferred_element_type=jnp.float32)


def _raw_gram(zt):
    """Pallas-computed raw Gram matrix Z^T Z for Z^T of shape (G, B)."""
    g, b_cols = zt.shape
    itemsize = zt.dtype.itemsize
    bytes_per_col = g * itemsize

    if _round_up(b_cols, _LANE) * bytes_per_col <= _SINGLE_BLOCK_BYTES:
        # Small/medium batch: single grid step, whole batch resident in VMEM.
        num_parts = 1
        tb = _round_up(b_cols, _LANE)
    else:
        # Large batch: stream multi-MiB lane-dense blocks; split the reduction
        # over two partial accumulators (one per TensorCore on v7x).
        num_parts = 2
        total_bytes = b_cols * bytes_per_col
        n_steps = max(
            num_parts,
            num_parts * pl.cdiv(total_bytes, num_parts * _STREAM_BLOCK_BYTES))
        tb = _round_up(pl.cdiv(b_cols, n_steps), _LANE)

    cols_per_part = _round_up(pl.cdiv(b_cols, num_parts), tb)
    b_pad = num_parts * cols_per_part
    if b_pad != b_cols:
        # Zero columns (including the ones row) are exact no-ops for Z^T Z.
        zt = jnp.pad(zt, ((0, 0), (0, b_pad - b_cols)))
    steps = cols_per_part // tb

    parts = pl.pallas_call(
        _gram_kernel,
        out_shape=jax.ShapeDtypeStruct((num_parts, g, g), jnp.float32),
        grid_spec=pltpu.PrefetchScalarGridSpec(
            num_scalar_prefetch=0,
            grid=(num_parts, steps),
            in_specs=[pl.BlockSpec((g, tb), lambda c, i: (0, c * steps + i))],
            out_specs=pl.BlockSpec((None, g, g), lambda c, i: (c, 0, 0)),
        ),
        compiler_params=pltpu.CompilerParams(
            dimension_semantics=("parallel", "arbitrary"),
            vmem_limit_bytes=32 * 1024 * 1024,
        ),
        cost_estimate=pl.CostEstimate(
            flops=2 * b_pad * g * g,
            transcendentals=0,
            bytes_accessed=b_pad * g * itemsize + num_parts * g * g * 4,
        ),
    )(zt)
    return jnp.sum(parts, axis=0)                         # (G, G)


# ---------------------------------------------------------------------------
# Covariances: Pallas Gram + tiny centering epilogue in plain JAX
# ---------------------------------------------------------------------------
def _covariances(x, y):
    """Mean-removed covariances (C00, C0t, Ctt) / (B-1) for (B, S) inputs."""
    assert x.shape == y.shape and x.ndim == 2
    b, s = x.shape

    # Lane-dense, ones-augmented transposed design matrix Z^T: (2S+1, B).
    ones_row = jnp.ones((1, b), dtype=jnp.float32)
    zt = jnp.concatenate(
        [x.astype(jnp.float32).T, y.astype(jnp.float32).T, ones_row], axis=0)

    gram = _raw_gram(zt)                                  # (2S+1, 2S+1) f32

    sum_x = gram[2 * s, :s]
    sum_y = gram[2 * s, s:2 * s]
    mean_x = sum_x / b
    mean_y = sum_y / b
    inv_bm1 = 1.0 / float(max(b - 1, 1))

    c00 = (gram[:s, :s] - b * jnp.outer(mean_x, mean_x)) * inv_bm1
    c0t = (gram[:s, s:2 * s] - b * jnp.outer(mean_x, mean_y)) * inv_bm1
    ctt = (gram[s:2 * s, s:2 * s] - b * jnp.outer(mean_y, mean_y)) * inv_bm1
    return c00, c0t, ctt


# ---------------------------------------------------------------------------
# Tiny (S, S) epilogue in plain JAX
# ---------------------------------------------------------------------------
def _sym_inverse_sqrt(mat, epsilon: float, mode: str):
    """C^{-1/2} of a small symmetric PSD matrix (regularized / truncated)."""
    # TODO(synk): the eigendecomposition (torch.linalg.eigh inside sym_inverse)
    # has no Pallas/Mosaic equivalent; done with jnp.linalg.eigh on the tiny
    # (S, S) matrix.
    w, v = jnp.linalg.eigh(mat)
    if mode == "regularize":
        w = jnp.abs(w) + epsilon
        inv_sqrt_w = 1.0 / jnp.sqrt(w)
    elif mode == "trunc":
        keep = w > epsilon
        w_safe = jnp.where(keep, w, 1.0)
        inv_sqrt_w = jnp.where(keep, 1.0 / jnp.sqrt(w_safe), 0.0)
    else:
        raise ValueError(f"unknown mode: {mode}")
    return (v * inv_sqrt_w[None, :]) @ v.T


def estimate_koopman_matrix(data, data_lagged, *, epsilon=1e-6,
                            mode="regularize", symmetrized=False):
    c00, c0t, ctt = _covariances(data, data_lagged)
    if symmetrized:
        c00 = 0.5 * (c00 + ctt)
        c0t = 0.5 * (c0t + c0t.T)
        ctt = c00
    c00_isqrt = _sym_inverse_sqrt(c00, epsilon, mode)
    ctt_isqrt = _sym_inverse_sqrt(ctt, epsilon, mode)
    return c00_isqrt @ c0t @ ctt_isqrt


def vamp_loss(data, *, epsilon=1e-6, mode="regularize", symmetrized=False):
    """Forward pass of VAMPLoss: data = (probs_t, probs_t+tau), each (B, S)."""
    assert len(data) == 2
    koopman = estimate_koopman_matrix(
        data[0], data[1], epsilon=epsilon, mode=mode, symmetrized=symmetrized)
    score = jnp.sum(koopman * koopman) + 1.0              # ||K||_F^2 + 1
    return -score


if __name__ == "__main__":
    key = jax.random.PRNGKey(0)
    B, S = 512, 8            # batch of transition pairs, n_states (softmax dim)
    k0, k1 = jax.random.split(key)

    # Softmax probabilities of the batch of transition pairs (as in the module).
    probs_t = jax.nn.softmax(
        jax.random.normal(k0, (B, S), dtype=jnp.float32), axis=-1)
    probs_tau = jax.nn.softmax(
        jax.random.normal(k1, (B, S), dtype=jnp.float32), axis=-1)

    loss = vamp_loss((probs_t, probs_tau))
    jax.block_until_ready(loss)
    print("KERNEL_OK")
</pallas_src>

<mosaic_0001>
module attributes {stable_mosaic.version = 11 : i64} {
  func.func @_gram_kernel(%arg0: i32, %arg1: i32, %arg2: memref<17x512xf32, #tpu.memory_space<vmem>>, %arg3: memref<1x17x17xf32, #tpu.memory_space<vmem>>) attributes {dimension_semantics = [#tpu.dimension_semantics<parallel>, #tpu.dimension_semantics<arbitrary>], iteration_bounds = array<i64: 1, 1>, scalar_prefetch = 0 : i64, scratch_operands = 0 : i64, tpu.core_type = #tpu.core_type<tc>, window_params = [{transform_indices = @transform_0, window_bounds = array<i64: 17, 512>}, {transform_indices = @transform_1, window_bounds = array<i64: 1, 17, 17>}]} {
    %c0_i32 = arith.constant 0 : i32
    %0 = arith.cmpi eq, %arg1, %c0_i32 : i32
    %1 = arith.extui %0 : i1 to i32
    %c0_i32_0 = arith.constant 0 : i32
    %2 = arith.cmpi ne, %1, %c0_i32_0 : i32
    scf.if %2 {
      %cst_8 = arith.constant 0.000000e+00 : f32
      %11 = vector.broadcast %cst_8 : f32 to vector<17x17xf32>
      %c0_9 = arith.constant 0 : index
      %c0_10 = arith.constant 0 : index
      %c0_11 = arith.constant 0 : index
      %12 = vector.load %arg3[%c0_9, %c0_10, %c0_11] : memref<1x17x17xf32, #tpu.memory_space<vmem>>, vector<1x17x17xf32>
      %13 = vector.shape_cast %12 : vector<1x17x17xf32> to vector<17x17xf32>
      %14 = vector.shape_cast %11 : vector<17x17xf32> to vector<1x17x17xf32>
      tpu.vector_store %arg3[%c0_9, %c0_10, %c0_11], %14 {strides = array<i32>} : memref<1x17x17xf32, #tpu.memory_space<vmem>>, vector<1x17x17xf32>,
    } else {
    }
    %c0 = arith.constant 0 : index
    %c0_1 = arith.constant 0 : index
    %3 = vector.load %arg2[%c0, %c0_1] : memref<17x512xf32, #tpu.memory_space<vmem>>, vector<17x512xf32>
    %c0_2 = arith.constant 0 : index
    %c0_3 = arith.constant 0 : index
    %c0_4 = arith.constant 0 : index
    %4 = vector.load %arg3[%c0_2, %c0_3, %c0_4] : memref<1x17x17xf32, #tpu.memory_space<vmem>>, vector<1x17x17xf32>
    %5 = vector.shape_cast %4 : vector<1x17x17xf32> to vector<17x17xf32>
    %cst = arith.constant dense<0.000000e+00> : vector<17x17xf32>
    %6 = tpu.matmul %3, %3, %cst {dimension_numbers = #tpu.dot_dimension_numbers<[1], [1], [0], [0], [0, 0, 1, 0], [], []>} : vector<17x512xf32>, vector<17x512xf32>, vector<17x17xf32> -> vector<17x17xf32>
    %7 = arith.addf %5, %6 : vector<17x17xf32>
    %c0_5 = arith.constant 0 : index
    %c0_6 = arith.constant 0 : index
    %c0_7 = arith.constant 0 : index
    %8 = vector.load %arg3[%c0_5, %c0_6, %c0_7] : memref<1x17x17xf32, #tpu.memory_space<vmem>>, vector<1x17x17xf32>
    %9 = vector.shape_cast %8 : vector<1x17x17xf32> to vector<17x17xf32>
    %10 = vector.shape_cast %7 : vector<17x17xf32> to vector<1x17x17xf32>
    tpu.vector_store %arg3[%c0_5, %c0_6, %c0_7], %10 {strides = array<i32>} : memref<1x17x17xf32, #tpu.memory_space<vmem>>, vector<1x17x17xf32>,
    return
  }
  func.func @transform_0(%arg0: i32, %arg1: i32) -> (i32, i32) {
    %c1_i32 = arith.constant 1 : i32
    %0 = arith.muli %arg0, %c1_i32 : i32
    %1 = arith.addi %0, %arg1 : i32
    %c0_i32 = arith.constant 0 : i32
    %c0_i32_0 = arith.constant 0 : i32
    return %c0_i32, %1 : i32, i32
  }
  func.func @transform_1(%arg0: i32, %arg1: i32) -> (i32, i32, i32) {
    %c0_i32 = arith.constant 0 : i32
    %c0_i32_0 = arith.constant 0 : i32
    %c0_i32_1 = arith.constant 0 : i32
    return %arg0, %c0_i32, %c0_i32_0 : i32, i32, i32
  }
}

</mosaic_0001>

<bundles_post_ra>
// kernel: tpu_custom_call.1
= control target key start
LH: loop header
LB: loop body
LE: loop exit
PB: predicated region body
PF: predicated region fallthrough
CT: control target
= control target key end

     0   :  { %6 = vsyncpa [#allocation3], 0  ;;  %s261_s6 = smov [#allocation2]   ;;  %s320_s0 = inlined_call_operand.hbm [shape: f32[17,512], index: 0, kind: input, shape index: {}]   ;;  %s321_s1 = inlined_call_operand.vmem [shape: f32[1,17,17], index: 1, kind: output, shape index: {}]  }
   0x1   :  { %s16_s7 = sshll.u32 %s261_s6, 4  ;;  %s237_s10 = scalar_lea.hbm %s320_s0, 1536  ;;  %s17_s7 = int_to_ptr.vmem [resolvable:$true] %s16_s7 }
   0x2   :  { %p238_p0 = scmp.ne.s32.totalorder %s320_s0, %s237_s10  ;;  %p241_p1 = scmp.lt.u32.totalorder %s237_s10, %s320_s0 }
   0x4   :  { %p243_p2 = pnand %p241_p1, %p238_p0 }
   0x6   :  { %246 = shalt.err (!%p243_p2)
}
   0x7   :  { %s247_s15 = scalar_lea.vmem %s17_s7, 1536  ;;  %p252_p4 = scmp.lt.s32.totalorder %s17_s7, %s17_s7 }
   0x8   :  { %p248_p3 = scmp.ne.s32.totalorder %s17_s7, %s247_s15  ;;  %p253_p5 = scmp.lt.s32.totalorder %s247_s15, %s247_s15 }
   0xa   :  { %p254_p6 = por %p253_p5, %p252_p4 }
   0xc   :  { %p255_p7 = pnand %p254_p6, %p248_p3 }
   0xe   :  { %258 = shalt.err (!%p255_p7)
}
   0xf   :  { %s262_s16 = smov 512   ;;  %s263_s17 = smov 32  }
  0x10   :  { %22 = dma.hbm_to_vmem [thread:$0]  %s320_s0, 1536, %s17_s7, [#allocation3], %s262_s16, %s262_s16, %s263_s17  }
  0x11   :  { %259 = dma.done.wait [#allocation3], 1536  }
  0x12   :  { %260 = vsyncadd [#allocation3], 4294965760  ;;  %v38_v0 = vld [vmem:[#allocation2 + $0x8] sm:$0xff]  ;;  %v40_v2 = vld [vmem:[#allocation2 + $0x18] sm:$0xff]  ;;  %vm32_vm0 = vcmask 138240   ;;  %v264_v16 = vmov 0.0  }
  0x13   :  { %v42_v1 = vld [vmem:[#allocation2 + $0x28] sm:$0xff]  ;;  %v44_v4 = vld [vmem:[#allocation2 + $0x38] sm:$0xff]  ;;  %v37_v5 = vld [vmem:[#allocation2] sm:$0xff]  ;;  %116 = vmatprep.mubr.f32.mxu0 %v38_v0  ;;  %196 = vmatprep.mubr.f32.mxu1 %v40_v2  ;;  %33 = vst.msk [vmem:[%s321_s1] sm:$0xff] %vm32_vm0, %v264_v16  ;;  %vm35_vm1 = vcmask 131072  }
  0x14   :  { %v225_v3 = vpack.c.bf16 %v42_v1, %v38_v0  ;;  %v41_v6 = vld [vmem:[#allocation2 + $0x20] sm:$0xff]  ;;  %v229_v7 = vpack.c.bf16 %v44_v4, %v40_v2  ;;  %v39_v9 = vld [vmem:[#allocation2 + $0x10] sm:$0xff]  ;;  %v46_v11 = vld [vmem:[#allocation2 + $0x48] sm:$0x1]  ;;  %34 = vst.msk [vmem:[%s321_s1 + $0x8] sm:$0xff] %vm32_vm0, %v264_v16 }
  0x15   :  { %v227_v8 = vpack.c.bf16 %v41_v6, %v37_v5  ;;  %v43_v10 = vld [vmem:[#allocation2 + $0x30] sm:$0xff]  ;;  %v48_v13 = vld [vmem:[#allocation2 + $0x58] sm:$0x1]  ;;  %v45_v14 = vld [vmem:[#allocation2 + $0x40] sm:$0x1] }
  0x16   :  { %226 = vmatprep.subr.bf16.mxu0 %v225_v3  ;;  %v231_v12 = vpack.c.bf16 %v43_v10, %v39_v9  ;;  %230 = vmatprep.subr.bf16.mxu1 %v229_v7  ;;  %v47_v15 = vld [vmem:[#allocation2 + $0x50] sm:$0x1]  ;;  %36 = vst.msk [vmem:[%s321_s1 + $0x10] sm:$0x1] %vm35_vm1, %v264_v16 }
  0x17   :  { %228 = vmatpush1.bf16.xpose.msra.mxu0 %v227_v8 }
  0x18   :  { %232 = vmatpush1.bf16.xpose.msra.mxu1 %v231_v12  ;;  %56 = vmatprep.subr.mxu0 %v46_v11 }
  0x19   :  { %136 = vmatprep.subr.mxu1 %v48_v13 }
  0x1a   :  { %v49_v18 = vld [vmem:[%s321_s1] sm:$0xff] }
  0x1b   :  { %v50_v25 = vld [vmem:[%s321_s1 + $0x8] sm:$0xff] }
  0x1d   :  { %v51_v32 = vld [vmem:[%s321_s1 + $0x10] sm:$0x1] }
  0x1f   :  { %57 = vmatpush1.xpose.msra.mxu0 %v45_v14 }
  0x20   :  { %137 = vmatpush1.xpose.msra.mxu1 %v47_v15 }
  0x22   :  { %117 = vmatmul.mubr.f32.vlgmr.msra.gmra.mrb[0].mxu0 %v37_v5 }
  0x23   :  { %197 = vmatmul.mubr.f32.vlgmr.msra.gmra.mrb[0].mxu1 %v39_v9  ;;  %121 = vmatprep.mubr.f32.mxu0 %v42_v1 }
  0x24   :  { %201 = vmatprep.mubr.f32.mxu1 %v44_v4 }
  0x26   :  { %122 = vmatmul.mubr.f32.gmra.mrb[2].mxu0 %v41_v6 }
  0x27   :  { %202 = vmatmul.mubr.f32.gmra.mrb[2].mxu1 %v43_v10  ;;  %126 = vmatprep.mubr.f32.mxu0 %v46_v11 }
  0x28   :  { %206 = vmatprep.mubr.f32.mxu1 %v48_v13 }
  0x2a   :  { %127 = vmatmul.mubr.f32.gmra.mrb[4].mxu0 %v45_v14 }
  0x2b   :  { %207 = vmatmul.mubr.f32.gmra.mrb[4].mxu1 %v47_v15 }
  0xf5   :  { %v118_v17 = vpop.f32.mrb[0].mxu0 }
  0xf6   :  { %v198_v19 = vpop.f32.mrb[0].mxu1  ;;  %v120_v20 = vpop.f32.mrb[1].mxu0 }
  0xf7   :  { %v199_v21 = vadd.f32 %v198_v19, %v118_v17  ;;  %v200_v22 = vpop.f32.mrb[1].mxu1 }
  0xf9   :  { %v212_v23 = vadd.f32 %v199_v21, %v49_v18  ;;  %v123_v24 = vpop.f32.mrb[2].mxu0 }
  0xfa   :  { %v203_v26 = vpop.f32.mrb[2].mxu1  ;;  %v125_v27 = vpop.f32.mrb[3].mxu0 }
  0xfb   :  { %216 = vst.msk [vmem:[%s321_s1] sm:$0xff] %vm32_vm0, %v212_v23  ;;  %v204_v28 = vadd.f32 %v203_v26, %v123_v24  ;;  %v205_v29 = vpop.f32.mrb[3].mxu1 }
  0xfd   :  { %v213_v30 = vadd.f32 %v204_v28, %v50_v25  ;;  %v128_v31 = vpop.f32.mrb[4].mxu0 }
  0xfe   :  { %v208_v33 = vpop.f32.mrb[4].mxu1  ;;  %v130_v34 = vpop.f32.mrb[5].mxu0 }
  0xff   :  { %217 = vst.msk [vmem:[%s321_s1 + $0x8] sm:$0xff] %vm32_vm0, %v213_v30  ;;  %v209_v35 = vadd.f32 %v208_v33, %v128_v31  ;;  %v210_v36 = vpop.f32.mrb[5].mxu1 }
 0x101   :  { %v214_v37 = vadd.f32 %v209_v35, %v51_v32 }
 0x103   :  { %219 = vst.msk [vmem:[%s321_s1 + $0x10] sm:$0x1] %vm35_vm1, %v214_v37 }
 0x104   :  { %224 = vsyncpa [#allocation3], 1 }

</bundles_post_ra>
